<compile_context>
chip_gen: v6e
topology: v6e:2x2x1
jax: 0.10.0
libtpu: 0.0.40
codegen_flags: <defaults>
</compile_context>

<pallas_src>
import jax
import jax.numpy as jnp
from jax.experimental import pallas as pl
from jax.experimental.pallas import tpu as pltpu


def _round_up(x, m):
    return ((x + m - 1) // m) * m


def _pick_batch_tile(batch, tile_b):
    """Batch tile: big (default 2048), multiple of 8, but split into >=2 grid
    steps when the batch allows so v7x's two TensorCores both get work."""
    if batch < 8:
        # Block equal to the full array dim is legal even when < 8 rows.
        return batch
    half = _round_up(pl.cdiv(batch, 2), 8)
    return max(8, min(tile_b, half))


def _dqn_kernel(x_ref, w1_ref, b1_ref, w2_ref, b2_ref, q_ref):
    # Cast inside the kernel (mirrors obs.float(); VPU slot has plenty of
    # slack).  If obs is already bf16 this is a no-op layout-wise.
    x = x_ref[...].astype(w1_ref.dtype)
    # Hidden layer: bf16 MXU matmul, f32 accumulation; bias add + ReLU on VPU.
    h = jnp.dot(x, w1_ref[...], preferred_element_type=jnp.float32)
    h = jnp.maximum(h + b1_ref[...], 0.0)
    # Output layer.
    q = jnp.dot(h.astype(w2_ref.dtype), w2_ref[...],
                preferred_element_type=jnp.float32)
    q_ref[...] = (q + b2_ref[...]).astype(q_ref.dtype)


def dqn_forward(obs, w1, b1, w2, b2, *, tile_b=2048):
    """obs: [B, D_in] (f32 or bf16; bf16 halves input DMA bytes).
    Returns q: [B, D_out] float32.

    Weights w1:[D_in,H], w2:[H,D_out] (bf16 or f32); biases b1:[1,H],
    b2:[1,D_out] f32.  No wrapper-side padding: the ragged last batch block is
    handled by Pallas block masking (safe — no cross-row reductions).
    """
    B, d_in = obs.shape
    d_h = w1.shape[1]
    d_out = w2.shape[1]

    tm = _pick_batch_tile(B, tile_b)
    grid = (pl.cdiv(B, tm),)

    return pl.pallas_call(
        _dqn_kernel,
        out_shape=jax.ShapeDtypeStruct((B, d_out), jnp.float32),
        grid_spec=pltpu.PrefetchScalarGridSpec(
            num_scalar_prefetch=0,
            grid=grid,
            in_specs=[
                # obs: tiled over the batch axis (ragged last block masked).
                pl.BlockSpec((tm, d_in), lambda i: (i, 0)),
                # params: constant index_map -> resident in VMEM across steps.
                pl.BlockSpec((d_in, d_h), lambda i: (0, 0)),
                pl.BlockSpec((1, d_h), lambda i: (0, 0)),
                pl.BlockSpec((d_h, d_out), lambda i: (0, 0)),
                pl.BlockSpec((1, d_out), lambda i: (0, 0)),
            ],
            out_specs=pl.BlockSpec((tm, d_out), lambda i: (i, 0)),
        ),
        compiler_params=pltpu.CompilerParams(
            dimension_semantics=("parallel",),   # shards batch over v7x's 2 TCs
            vmem_limit_bytes=32 * 1024 * 1024,   # headroom only; safe on v7x
        ),
    )(obs, w1, b1, w2, b2)


def dqn_reference(obs, w1, b1, w2, b2):
    """Pure-JAX reference with the same precision recipe as the kernel."""
    x = obs.astype(w1.dtype)
    h = jnp.dot(x, w1, preferred_element_type=jnp.float32) + b1
    h = jnp.maximum(h, 0.0).astype(w2.dtype)
    return jnp.dot(h, w2, preferred_element_type=jnp.float32) + b2


def init_dqn_params(key, input_size, hidden_size, output_size,
                    param_dtype=jnp.bfloat16):
    """nn.Linear-style uniform(-1/sqrt(fan_in), +) init.

    Weights returned transposed to [in, out] and cast to param_dtype (bf16 by
    default to halve matmul-operand DMA bytes); biases kept f32.
    """
    d_in, d_h, d_out = input_size[-1], hidden_size[-1], output_size[-1]
    k1, k2, k3, k4 = jax.random.split(key, 4)
    lim1 = 1.0 / jnp.sqrt(jnp.float32(d_in))
    lim2 = 1.0 / jnp.sqrt(jnp.float32(d_h))
    w1 = jax.random.uniform(k1, (d_in, d_h), jnp.float32, -lim1, lim1)
    b1 = jax.random.uniform(k2, (1, d_h), jnp.float32, -lim1, lim1)
    w2 = jax.random.uniform(k3, (d_h, d_out), jnp.float32, -lim2, lim2)
    b2 = jax.random.uniform(k4, (1, d_out), jnp.float32, -lim2, lim2)
    return w1.astype(param_dtype), b1, w2.astype(param_dtype), b2


if __name__ == "__main__":
    key = jax.random.PRNGKey(0)
    kp, kx = jax.random.split(key)

    # Module config: input_size[-1]=16, hidden_size[-1]=32, output_size[-1]=8
    input_size, hidden_size, output_size = (16,), (32,), (8,)
    d_out = output_size[-1]

    w1, b1, w2, b2 = init_dqn_params(kp, input_size, hidden_size, output_size)

    # Case 1: B=512 f32 obs -> tile picker gives tm=256, grid=2 (both v7x TCs).
    obs = jax.random.normal(kx, (512, input_size[-1]), jnp.float32)
    q = dqn_forward(obs, w1, b1, w2, b2)
    jax.block_until_ready(q)
    ref = dqn_reference(obs, w1, b1, w2, b2)
    assert q.shape == (512, d_out) and q.dtype == jnp.float32
    assert jnp.allclose(q, ref, atol=1e-2, rtol=1e-2)

    # Case 2: ragged batch (B=1000) -> tm=504, grid=2; no wrapper pad/slice,
    # Pallas masks the partial last block.
    obs_r = jax.random.normal(jax.random.PRNGKey(1), (1000, input_size[-1]),
                              jnp.float32)
    q_r = dqn_forward(obs_r, w1, b1, w2, b2)
    jax.block_until_ready(q_r)
    ref_r = dqn_reference(obs_r, w1, b1, w2, b2)
    assert q_r.shape == (1000, d_out)
    assert jnp.allclose(q_r, ref_r, atol=1e-2, rtol=1e-2)

    # Case 3: tiny batch (B=4) -> single full-array block (block == array dims).
    obs_s = obs[:4]
    q_s = dqn_forward(obs_s, w1, b1, w2, b2)
    jax.block_until_ready(q_s)
    assert q_s.shape == (4, d_out)
    assert jnp.allclose(q_s, ref[:4], atol=1e-2, rtol=1e-2)

    # Case 4: bf16 obs (replay-buffer storage dtype) -> halves input DMA bytes,
    # same kernel, identical precision recipe as the reference.
    obs_bf = obs.astype(jnp.bfloat16)
    q_bf = dqn_forward(obs_bf, w1, b1, w2, b2)
    jax.block_until_ready(q_bf)
    ref_bf = dqn_reference(obs_bf, w1, b1, w2, b2)
    assert jnp.allclose(q_bf, ref_bf, atol=1e-2, rtol=1e-2)

    print("KERNEL_OK")
</pallas_src>

<mosaic_0001>
module attributes {stable_mosaic.version = 11 : i64} {
  func.func @_dqn_kernel(%arg0: i32, %arg1: memref<256x16xf32, #tpu.memory_space<vmem>>, %arg2: memref<16x32xbf16, #tpu.memory_space<vmem>>, %arg3: memref<1x32xf32, #tpu.memory_space<vmem>>, %arg4: memref<32x8xbf16, #tpu.memory_space<vmem>>, %arg5: memref<1x8xf32, #tpu.memory_space<vmem>>, %arg6: memref<256x8xf32, #tpu.memory_space<vmem>>) attributes {dimension_semantics = [#tpu.dimension_semantics<parallel>], iteration_bounds = array<i64: 2>, scalar_prefetch = 0 : i64, scratch_operands = 0 : i64, tpu.core_type = #tpu.core_type<tc>, window_params = [{transform_indices = @transform_0, window_bounds = array<i64: 256, 16>}, {pipeline_mode = #tpu.pipeline_mode<synchronous>, transform_indices = @transform_1, window_bounds = array<i64: 16, 32>}, {pipeline_mode = #tpu.pipeline_mode<synchronous>, transform_indices = @transform_2, window_bounds = array<i64: 1, 32>}, {pipeline_mode = #tpu.pipeline_mode<synchronous>, transform_indices = @transform_3, window_bounds = array<i64: 32, 8>}, {pipeline_mode = #tpu.pipeline_mode<synchronous>, transform_indices = @transform_4, window_bounds = array<i64: 1, 8>}, {transform_indices = @transform_5, window_bounds = array<i64: 256, 8>}]} {
    %c0 = arith.constant 0 : index
    %c0_0 = arith.constant 0 : index
    %0 = vector.load %arg1[%c0, %c0_0] : memref<256x16xf32, #tpu.memory_space<vmem>>, vector<256x16xf32>
    %1 = arith.truncf %0 : vector<256x16xf32> to vector<256x16xbf16>
    %c0_1 = arith.constant 0 : index
    %c0_2 = arith.constant 0 : index
    %2 = vector.load %arg2[%c0_1, %c0_2] : memref<16x32xbf16, #tpu.memory_space<vmem>>, vector<16x32xbf16>
    %cst = arith.constant dense<0.000000e+00> : vector<256x32xf32>
    %3 = tpu.matmul %1, %2, %cst {dimension_numbers = #tpu.dot_dimension_numbers<[1], [0], [0], [1], [0, 0, 1, 1], [], []>} : vector<256x16xbf16>, vector<16x32xbf16>, vector<256x32xf32> -> vector<256x32xf32>
    %c0_3 = arith.constant 0 : index
    %c0_4 = arith.constant 0 : index
    %4 = vector.load %arg3[%c0_3, %c0_4] : memref<1x32xf32, #tpu.memory_space<vmem>>, vector<1x32xf32>
    %5 = vector.broadcast %4 : vector<1x32xf32> to vector<256x32xf32>
    %6 = arith.addf %3, %5 : vector<256x32xf32>
    %cst_5 = arith.constant 0.000000e+00 : f32
    %7 = vector.broadcast %cst_5 : f32 to vector<256x32xf32>
    %8 = arith.maximumf %6, %7 : vector<256x32xf32>
    %9 = arith.truncf %8 : vector<256x32xf32> to vector<256x32xbf16>
    %c0_6 = arith.constant 0 : index
    %c0_7 = arith.constant 0 : index
    %10 = vector.load %arg4[%c0_6, %c0_7] : memref<32x8xbf16, #tpu.memory_space<vmem>>, vector<32x8xbf16>
    %cst_8 = arith.constant dense<0.000000e+00> : vector<256x8xf32>
    %11 = tpu.matmul %9, %10, %cst_8 {dimension_numbers = #tpu.dot_dimension_numbers<[1], [0], [0], [1], [0, 0, 1, 1], [], []>} : vector<256x32xbf16>, vector<32x8xbf16>, vector<256x8xf32> -> vector<256x8xf32>
    %c0_9 = arith.constant 0 : index
    %c0_10 = arith.constant 0 : index
    %12 = vector.load %arg5[%c0_9, %c0_10] : memref<1x8xf32, #tpu.memory_space<vmem>>, vector<1x8xf32>
    %13 = vector.broadcast %12 : vector<1x8xf32> to vector<256x8xf32>
    %14 = arith.addf %11, %13 : vector<256x8xf32>
    %c0_11 = arith.constant 0 : index
    %c0_12 = arith.constant 0 : index
    %15 = vector.load %arg6[%c0_11, %c0_12] : memref<256x8xf32, #tpu.memory_space<vmem>>, vector<256x8xf32>
    tpu.vector_store %arg6[%c0_11, %c0_12], %14 {strides = array<i32>} : memref<256x8xf32, #tpu.memory_space<vmem>>, vector<256x8xf32>,
    return
  }
  func.func @transform_0(%arg0: i32) -> (i32, i32) {
    %c0_i32 = arith.constant 0 : i32
    %c0_i32_0 = arith.constant 0 : i32
    return %arg0, %c0_i32 : i32, i32
  }
  func.func @transform_1(%arg0: i32) -> (i32, i32) {
    %c0_i32 = arith.constant 0 : i32
    %c0_i32_0 = arith.constant 0 : i32
    %c0_i32_1 = arith.constant 0 : i32
    return %c0_i32, %c0_i32_0 : i32, i32
  }
  func.func @transform_2(%arg0: i32) -> (i32, i32) {
    %c0_i32 = arith.constant 0 : i32
    %c0_i32_0 = arith.constant 0 : i32
    %c0_i32_1 = arith.constant 0 : i32
    return %c0_i32, %c0_i32_0 : i32, i32
  }
  func.func @transform_3(%arg0: i32) -> (i32, i32) {
    %c0_i32 = arith.constant 0 : i32
    %c0_i32_0 = arith.constant 0 : i32
    %c0_i32_1 = arith.constant 0 : i32
    return %c0_i32, %c0_i32_0 : i32, i32
  }
  func.func @transform_4(%arg0: i32) -> (i32, i32) {
    %c0_i32 = arith.constant 0 : i32
    %c0_i32_0 = arith.constant 0 : i32
    %c0_i32_1 = arith.constant 0 : i32
    return %c0_i32, %c0_i32_0 : i32, i32
  }
  func.func @transform_5(%arg0: i32) -> (i32, i32) {
    %c0_i32 = arith.constant 0 : i32
    %c0_i32_0 = arith.constant 0 : i32
    return %arg0, %c0_i32 : i32, i32
  }
}

</mosaic_0001>

<bundles_post_ra>
// kernel: tpu_custom_call.1
= control target key start
LH: loop header
LB: loop body
LE: loop exit
PB: predicated region body
PF: predicated region fallthrough
CT: control target
= control target key end

     0   :  { %s1074_s18 = smov 0   ;;  %s1313_s0 = inlined_call_operand.vmem [shape: f32[512,16], index: 0, kind: input, shape index: {}]   ;;  %s1314_s1 = inlined_call_operand.vmem [shape: bf16[16,32], index: 1, kind: input, shape index: {}]   ;;  %s1315_s2 = inlined_call_operand.vmem [shape: f32[1,32], index: 2, kind: input, shape index: {}]   ;;  %s1316_s3 = inlined_call_operand.vmem [shape: bf16[32,8], index: 3, kind: input, shape index: {}]   ;;  %s1317_s4 = inlined_call_operand.vmem [shape: f32[1,8], index: 4, kind: input, shape index: {}]   ;;  %s1318_s5 = inlined_call_operand.vmem [shape: f32[512,8], index: 5, kind: output, shape index: {}]  }
   0x1 LB: > { %s872_s19 = sadd.s32 4294967295, %s1042_s18   ;;  %p876_p0 = scmp.ge.s32.totalorder %s1042_s18, 1  ;;  %s1042_s18 = sphi %s1074_s18, %s15_s18  }
   0x2   : > { %p188_p1 = scmp.lt.s32.totalorder %s1042_s18, 3 }
   0x4   : > { %p189_p2 = pnand %p876_p0, %p188_p1 }
   0x5   : > { %s877_s22 = sshll.u32 (!%p189_p2), %s872_s19, 5 }
   0x6   : > { %192 = sbr.rel (%p189_p2) target bundleno = 482 (0x1e2), region = 40  ;;  %p217_p3 = scmp.lt.s32.totalorder (!%p189_p2), %s877_s22, 63 }
   0xb   : > { %v1033_v0 = vld [vmem:[%s1314_s1] sm:$0xff]   ;;  %s1320_s22 = smov (!%p217_p3, %s877_s22), 63  ;;  %vm292_vm0 = vcmask 130048   ;;  %v1034_v49 = vld [vmem:[%s1316_s3 + $0x8] sm:$0xff]   ;;  %vm573_vm1 = vcmask 261120   ;;  %vm783_vm2 = vcmask 64512  }
   0xc   : > { %955 = vmatprep.subr.bf16.mxu0 %v1033_v0  ;;  %s878_s23 = sshll.u32 %s1320_s22, 3  ;;  %989 = vmatprep.subr.bf16.mxu1 %v1034_v49  ;;  %v1035_v50 = vld [vmem:[%s1316_s3] sm:$0xff]  }
   0xd   : > { %956 = vmatpush3.bf16.msra.mxu0 %v1033_v0  ;;  %s1093_s26 = scalar_lea.vmem %s1313_s0, %s878_s23  ;;  %990 = vmatpush3.bf16.msra.mxu1 %v1034_v49  ;;  %v1152_v53 = vld [vmem:[%s1315_s2] ss:$0 sm:$0xff]  ;;  %s1212_s12 = scalar_lea.vmem %s1318_s5, %s878_s23 }
   0xe   : > { %v229_v1 = vld [vmem:[%s1093_s26] sm:$0xff]  ;;  %v230_v2 = vld [vmem:[%s1093_s26 + $0x8] sm:$0xff]  ;;  %v231_v3 = vld [vmem:[%s1093_s26 + $0x10] sm:$0xff]  ;;  %991 = vmatprep.subr.bf16.mxu1 %v1035_v50 }
   0xf   : > { %v261_v4 = vpack.c.bf16 %v230_v2, %v229_v1  ;;  %v232_v5 = vld [vmem:[%s1093_s26 + $0x18] sm:$0xff]  ;;  %v233_v6 = vld [vmem:[%s1093_s26 + $0x20] sm:$0xff]  ;;  %v234_v7 = vld [vmem:[%s1093_s26 + $0x28] sm:$0xff] }
  0x10   : > { %v262_v8 = vpack.c.bf16 %v232_v5, %v231_v3  ;;  %v263_v9 = vpack.c.bf16 %v234_v7, %v233_v6  ;;  %v235_v10 = vld [vmem:[%s1093_s26 + $0x30] sm:$0xff]  ;;  %v236_v11 = vld [vmem:[%s1093_s26 + $0x38] sm:$0xff]  ;;  %v237_v12 = vld [vmem:[%s1093_s26 + $0x40] sm:$0xff] }
  0x11   : > { %957 = vmatprep.mubr.msk.bf16.mxu0 %vm292_vm0, %v261_v4  ;;  %v238_v13 = vld [vmem:[%s1093_s26 + $0x48] sm:$0xff]  ;;  %v264_v14 = vpack.c.bf16 %v236_v11, %v235_v10  ;;  %v239_v16 = vld [vmem:[%s1093_s26 + $0x50] sm:$0xff]  ;;  %v240_v17 = vld [vmem:[%s1093_s26 + $0x58] sm:$0xff]  ;;  %992 = vmatpush3.bf16.msra.mxu1 %v1035_v50 }
  0x12   : > { %958 = vmatmul.mubr.msk.bf16.vlgmr.msra.gmra.mxu0 %vm292_vm0, %v262_v8  ;;  %v265_v15 = vpack.c.bf16 %v238_v13, %v237_v12  ;;  %v241_v18 = vld [vmem:[%s1093_s26 + $0x60] sm:$0xff]  ;;  %v242_v19 = vld [vmem:[%s1093_s26 + $0x68] sm:$0xff]  ;;  %v266_v20 = vpack.c.bf16 %v240_v17, %v239_v16  ;;  %v243_v22 = vld [vmem:[%s1093_s26 + $0x70] sm:$0xff] }
  0x13   : > { %961 = vmatprep.mubr.msk.bf16.mxu0 %vm292_vm0, %v263_v9  ;;  %v267_v21 = vpack.c.bf16 %v242_v19, %v241_v18  ;;  %v244_v23 = vld [vmem:[%s1093_s26 + $0x78] sm:$0xff]  ;;  %v245_v24 = vld [vmem:[%s1093_s26 + $0x80] sm:$0xff]  ;;  %v246_v25 = vld [vmem:[%s1093_s26 + $0x88] sm:$0xff] }
  0x14   : > { %v268_v26 = vpack.c.bf16 %v244_v23, %v243_v22  ;;  %v269_v27 = vpack.c.bf16 %v246_v25, %v245_v24  ;;  %v247_v28 = vld [vmem:[%s1093_s26 + $0x90] sm:$0xff]  ;;  %v248_v29 = vld [vmem:[%s1093_s26 + $0x98] sm:$0xff]  ;;  %v249_v30 = vld [vmem:[%s1093_s26 + $0xa0] sm:$0xff] }
  0x15   : > { %v250_v31 = vld [vmem:[%s1093_s26 + $0xa8] sm:$0xff]  ;;  %v270_v32 = vpack.c.bf16 %v248_v29, %v247_v28  ;;  %v251_v34 = vld [vmem:[%s1093_s26 + $0xb0] sm:$0xff]  ;;  %v252_v35 = vld [vmem:[%s1093_s26 + $0xb8] sm:$0xff] }
  0x16   : > { %v271_v33 = vpack.c.bf16 %v250_v31, %v249_v30  ;;  %v253_v36 = vld [vmem:[%s1093_s26 + $0xc0] sm:$0xff]  ;;  %v254_v37 = vld [vmem:[%s1093_s26 + $0xc8] sm:$0xff]  ;;  %v272_v38 = vpack.c.bf16 %v252_v35, %v251_v34  ;;  %v255_v40 = vld [vmem:[%s1093_s26 + $0xd0] sm:$0xff] }
  0x17   : > { %v273_v39 = vpack.c.bf16 %v254_v37, %v253_v36  ;;  %v256_v41 = vld [vmem:[%s1093_s26 + $0xd8] sm:$0xff]  ;;  %v257_v42 = vld [vmem:[%s1093_s26 + $0xe0] sm:$0xff]  ;;  %v258_v43 = vld [vmem:[%s1093_s26 + $0xe8] sm:$0xff] }
  0x18   : > { %v274_v44 = vpack.c.bf16 %v256_v41, %v255_v40  ;;  %v275_v45 = vpack.c.bf16 %v258_v43, %v257_v42  ;;  %v259_v46 = vld [vmem:[%s1093_s26 + $0xf0] sm:$0xff]  ;;  %v260_v47 = vld [vmem:[%s1093_s26 + $0xf8] sm:$0xff] }
  0x19   : > { %v276_v48 = vpack.c.bf16 %v260_v47, %v259_v46 }
  0x1a   : > { %962 = vmatmul.mubr.msk.bf16.gmra.mxu0 %vm292_vm0, %v264_v14 }
  0x1b   : > { %965 = vmatprep.mubr.msk.bf16.mxu0 %vm292_vm0, %v265_v15 }
  0x22   : > { %966 = vmatmul.mubr.msk.bf16.gmra.mxu0 %vm292_vm0, %v266_v20 }
  0x23   : > { %969 = vmatprep.mubr.msk.bf16.mxu0 %vm292_vm0, %v267_v21 }
  0x2a   : > { %970 = vmatmul.mubr.msk.bf16.gmra.mxu0 %vm292_vm0, %v268_v26 }
  0x2b   : > { %973 = vmatprep.mubr.msk.bf16.mxu0 %vm292_vm0, %v269_v27 }
  0x32   : > { %974 = vmatmul.mubr.msk.bf16.gmra.mxu0 %vm292_vm0, %v270_v32 }
  0x33   : > { %977 = vmatprep.mubr.msk.bf16.mxu0 %vm292_vm0, %v271_v33 }
  0x3a   : > { %978 = vmatmul.mubr.msk.bf16.gmra.mxu0 %vm292_vm0, %v272_v38 }
  0x3b   : > { %981 = vmatprep.mubr.msk.bf16.mxu0 %vm292_vm0, %v273_v39 }
  0x42   : > { %982 = vmatmul.mubr.msk.bf16.gmra.mxu0 %vm292_vm0, %v274_v44 }
  0x43   : > { %985 = vmatprep.mubr.msk.bf16.mxu0 %vm292_vm0, %v275_v45 }
  0x4a   : > { %986 = vmatmul.mubr.msk.bf16.gmra.mxu0 %vm292_vm0, %v276_v48 }
  0xd2   : > { %v959_v51 = vpop.f32.mrf.mxu0 }
  0xd3   : > { %v384_v57 = vadd.f32 %v959_v51, %v1152_v53 }
  0xd4   : > { %v375_v52 = vpop.f32.mrf.mxu0 }
  0xd5   : > { %v376_v55 = vadd.f32 %v1152_v53, %v375_v52  ;;  %v504_v0 = vmax.f32 %v384_v57, 0.0 }
  0xd6   : > { %v960_v54 = vpop.f32.mrf.mxu0 }
  0xd7   : > { %v387_v56 = vadd.f32 %v960_v54, %v1152_v53  ;;  %v502_v62 = vmax.f32 %v376_v55, 0.0 }
  0xd8   : > { %v378_v58 = vpop.f32.mrf.mxu0 }
  0xd9   : > { %v379_v59 = vadd.f32 %v1152_v53, %v378_v58  ;;  %v505_v60 = vmax.f32 %v387_v56, 0.0 }
  0xda   : > { %v963_v61 = vpop.f32.mrf.mxu0 }
  0xdb   : > { %v503_v63 = vmax.f32 %v379_v59, 0.0  ;;  %v535_v3 = vpack.c.bf16 %v505_v60, %v504_v0  ;;  %v400_v7 = vadd.f32 %v963_v61, %v1152_v53 }
  0xdc   : > { %v391_v1 = vpop.f32.mrf.mxu0 }
  0xdd   : > { %v534_v2 = vpack.c.bf16 %v503_v63, %v502_v62  ;;  %v392_v5 = vadd.f32 %v1152_v53, %v391_v1  ;;  %v508_v14 = vmax.f32 %v400_v7, 0.0 }
  0xde   : > { %v964_v4 = vpop.f32.mrf.mxu0 }
  0xdf   : > { %v403_v6 = vadd.f32 %v964_v4, %v1152_v53  ;;  %993 = vmatprep.mubr.msk.bf16.mxu1 %vm573_vm1, %v534_v2  ;;  %v506_v12 = vmax.f32 %v392_v5, 0.0 }
  0xe0   : > { %v394_v8 = vpop.f32.mrf.mxu0  ;;  %994 = vmatmul.mubr.msk.bf16.vlgmr.msra.gmra.mxu1 %vm573_vm1, %v535_v3 }
  0xe1   : > { %v395_v9 = vadd.f32 %v1152_v53, %v394_v8  ;;  %v509_v10 = vmax.f32 %v403_v6, 0.0 }
  0xe2   : > { %v967_v11 = vpop.f32.mrf.mxu0 }
  0xe3   : > { %v507_v13 = vmax.f32 %v395_v9, 0.0  ;;  %v537_v17 = vpack.c.bf16 %v509_v10, %v508_v14  ;;  %v416_v21 = vadd.f32 %v967_v11, %v1152_v53 }
  0xe4   : > { %v407_v15 = vpop.f32.mrf.mxu0 }
  0xe5   : > { %v536_v16 = vpack.c.bf16 %v507_v13, %v506_v12  ;;  %v408_v19 = vadd.f32 %v1152_v53, %v407_v15  ;;  %v512_v28 = vmax.f32 %v416_v21, 0.0 }
  0xe6   : > { %v968_v18 = vpop.f32.mrf.mxu0 }
  0xe7   : > { %v419_v20 = vadd.f32 %v968_v18, %v1152_v53  ;;  %997 = vmatprep.mubr.msk.bf16.mxu1 %vm573_vm1, %v536_v16  ;;  %v510_v26 = vmax.f32 %v408_v19, 0.0 }
  0xe8   : > { %v410_v22 = vpop.f32.mrf.mxu0  ;;  %998 = vmatmul.mubr.msk.bf16.gmra.mxu1 %vm573_vm1, %v537_v17 }
  0xe9   : > { %v411_v23 = vadd.f32 %v1152_v53, %v410_v22  ;;  %v513_v24 = vmax.f32 %v419_v20, 0.0 }
  0xea   : > { %v971_v25 = vpop.f32.mrf.mxu0 }
  0xeb   : > { %v511_v27 = vmax.f32 %v411_v23, 0.0  ;;  %v539_v31 = vpack.c.bf16 %v513_v24, %v512_v28  ;;  %v432_v35 = vadd.f32 %v971_v25, %v1152_v53 }
  0xec   : > { %v423_v29 = vpop.f32.mrf.mxu0 }
  0xed   : > { %v538_v30 = vpack.c.bf16 %v511_v27, %v510_v26  ;;  %v424_v33 = vadd.f32 %v1152_v53, %v423_v29  ;;  %v516_v42 = vmax.f32 %v432_v35, 0.0 }
  0xee   : > { %v972_v32 = vpop.f32.mrf.mxu0 }
  0xef   : > { %v435_v34 = vadd.f32 %v972_v32, %v1152_v53  ;;  %1001 = vmatprep.mubr.msk.bf16.mxu1 %vm573_vm1, %v538_v30  ;;  %v514_v40 = vmax.f32 %v424_v33, 0.0 }
  0xf0   : > { %v426_v36 = vpop.f32.mrf.mxu0  ;;  %1002 = vmatmul.mubr.msk.bf16.gmra.mxu1 %vm573_vm1, %v539_v31 }
  0xf1   : > { %v427_v37 = vadd.f32 %v1152_v53, %v426_v36  ;;  %v517_v38 = vmax.f32 %v435_v34, 0.0 }
  0xf2   : > { %v975_v39 = vpop.f32.mrf.mxu0 }
  0xf3   : > { %v515_v41 = vmax.f32 %v427_v37, 0.0  ;;  %v541_v45 = vpack.c.bf16 %v517_v38, %v516_v42  ;;  %v448_v49 = vadd.f32 %v975_v39, %v1152_v53  ;;  %v1205_v37 = vld [vmem:[%s1317_s4] ss:$0 sm:$0xff] }
  0xf4   : > { %v439_v43 = vpop.f32.mrf.mxu0 }
  0xf5   : > { %v540_v44 = vpack.c.bf16 %v515_v41, %v514_v40  ;;  %v440_v47 = vadd.f32 %v1152_v53, %v439_v43  ;;  %v520_v57 = vmax.f32 %v448_v49, 0.0 }
  0xf6   : > { %v976_v46 = vpop.f32.mrf.mxu0 }
  0xf7   : > { %v451_v48 = vadd.f32 %v976_v46, %v1152_v53  ;;  %1005 = vmatprep.mubr.msk.bf16.mxu1 %vm573_vm1, %v540_v44  ;;  %v518_v55 = vmax.f32 %v440_v47, 0.0 }
  0xf8   : > { %v442_v50 = vpop.f32.mrf.mxu0  ;;  %1006 = vmatmul.mubr.msk.bf16.gmra.mxu1 %vm573_vm1, %v541_v45 }
  0xf9   : > { %v443_v51 = vadd.f32 %v1152_v53, %v442_v50  ;;  %v521_v52 = vmax.f32 %v451_v48, 0.0 }
  0xfa   : > { %v979_v54 = vpop.f32.mrf.mxu0 }
  0xfb   : > { %v519_v56 = vmax.f32 %v443_v51, 0.0  ;;  %v543_v60 = vpack.c.bf16 %v521_v52, %v520_v57  ;;  %v464_v0 = vadd.f32 %v979_v54, %v1152_v53 }
  0xfc   : > { %v455_v58 = vpop.f32.mrf.mxu0 }
  0xfd   : > { %v542_v59 = vpack.c.bf16 %v519_v56, %v518_v55  ;;  %v456_v62 = vadd.f32 %v1152_v53, %v455_v58  ;;  %v524_v7 = vmax.f32 %v464_v0, 0.0 }
  0xfe   : > { %v980_v61 = vpop.f32.mrf.mxu0 }
  0xff   : > { %v467_v63 = vadd.f32 %v980_v61, %v1152_v53  ;;  %1009 = vmatprep.mubr.msk.bf16.mxu1 %vm573_vm1, %v542_v59  ;;  %v522_v5 = vmax.f32 %v456_v62, 0.0 }
 0x100   : > { %v458_v1 = vpop.f32.mrf.mxu0  ;;  %1010 = vmatmul.mubr.msk.bf16.gmra.mxu1 %vm573_vm1, %v543_v60 }
 0x101   : > { %v459_v2 = vadd.f32 %v1152_v53, %v458_v1  ;;  %v525_v3 = vmax.f32 %v467_v63, 0.0 }
 0x102   : > { %v983_v4 = vpop.f32.mrf.mxu0 }
 0x103   : > { %v523_v6 = vmax.f32 %v459_v2, 0.0  ;;  %v545_v10 = vpack.c.bf16 %v525_v3, %v524_v7  ;;  %v480_v14 = vadd.f32 %v983_v4, %v1152_v53 }
 0x104   : > { %v471_v8 = vpop.f32.mrf.mxu0 }
 0x105   : > { %v544_v9 = vpack.c.bf16 %v523_v6, %v522_v5  ;;  %v472_v12 = vadd.f32 %v1152_v53, %v471_v8  ;;  %v528_v21 = vmax.f32 %v480_v14, 0.0 }
 0x106   : > { %v984_v11 = vpop.f32.mrf.mxu0 }
 0x107   : > { %v483_v13 = vadd.f32 %v984_v11, %v1152_v53  ;;  %1013 = vmatprep.mubr.msk.bf16.mxu1 %vm573_vm1, %v544_v9  ;;  %v526_v19 = vmax.f32 %v472_v12, 0.0 }
 0x108   : > { %v474_v15 = vpop.f32.mrf.mxu0  ;;  %1014 = vmatmul.mubr.msk.bf16.gmra.mxu1 %vm573_vm1, %v545_v10 }
 0x109   : > { %v475_v16 = vadd.f32 %v1152_v53, %v474_v15  ;;  %v529_v17 = vmax.f32 %v483_v13, 0.0 }
 0x10a   : > { %v987_v18 = vpop.f32.mrf.mxu0 }
 0x10b   : > { %v527_v20 = vmax.f32 %v475_v16, 0.0  ;;  %v547_v24 = vpack.c.bf16 %v529_v17, %v528_v21  ;;  %v496_v28 = vadd.f32 %v987_v18, %v1152_v53 }
 0x10c   : > { %v487_v22 = vpop.f32.mrf.mxu0 }
 0x10d   : > { %v546_v23 = vpack.c.bf16 %v527_v20, %v526_v19  ;;  %v488_v26 = vadd.f32 %v1152_v53, %v487_v22  ;;  %v532_v34 = vmax.f32 %v496_v28, 0.0 }
 0x10e   : > { %v988_v25 = vpop.f32.mrf.mxu0 }
 0x10f   : > { %v499_v27 = vadd.f32 %v988_v25, %v1152_v53  ;;  %1017 = vmatprep.mubr.msk.bf16.mxu1 %vm573_vm1, %v546_v23  ;;  %v530_v32 = vmax.f32 %v488_v26, 0.0 }
 0x110   : > { %v490_v29 = vpop.f32.mrf.mxu0  ;;  %1018 = vmatmul.mubr.msk.bf16.gmra.mxu1 %vm573_vm1, %v547_v24 }
 0x111   : > { %v491_v30 = vadd.f32 %v1152_v53, %v490_v29  ;;  %v533_v31 = vmax.f32 %v499_v27, 0.0 }
 0x113   : > { %v531_v33 = vmax.f32 %v491_v30, 0.0  ;;  %v549_v36 = vpack.c.bf16 %v533_v31, %v532_v34 }
 0x115   : > { %v548_v35 = vpack.c.bf16 %v531_v33, %v530_v32 }
 0x117   : > { %1021 = vmatprep.mubr.msk.bf16.mxu1 %vm573_vm1, %v548_v35 }
 0x118   : > { %1022 = vmatmul.mubr.msk.bf16.gmra.mxu1 %vm573_vm1, %v549_v36 }
 0x1a0   : > { %v995_v53 = vpop.f32.mrf.mxu1 }
 0x1a1   : > { %v665_v38 = vadd.f32 %v995_v53, %v1205_v37 }
 0x1a2   : > { %v656_v39 = vpop.f32.mrf.mxu1 }
 0x1a3   : > { %786 = vst.msk [vmem:[%s1212_s12 + $0x10] sm:$0xff] %vm783_vm2, %v665_v38  ;;  %v657_v40 = vadd.f32 %v1205_v37, %v656_v39 }
 0x1a4   : > { %v996_v41 = vpop.f32.mrf.mxu1 }
 0x1a5   : > { %784 = vst.msk [vmem:[%s1212_s12] sm:$0xff] %vm783_vm2, %v657_v40  ;;  %v668_v42 = vadd.f32 %v996_v41, %v1205_v37 }
 0x1a6   : > { %v659_v43 = vpop.f32.mrf.mxu1 }
 0x1a7   : > { %787 = vst.msk [vmem:[%s1212_s12 + $0x18] sm:$0xff] %vm783_vm2, %v668_v42  ;;  %v660_v44 = vadd.f32 %v1205_v37, %v659_v43 }
 0x1a8   : > { %v999_v45 = vpop.f32.mrf.mxu1 }
 0x1a9   : > { %785 = vst.msk [vmem:[%s1212_s12 + $0x8] sm:$0xff] %vm783_vm2, %v660_v44  ;;  %v681_v46 = vadd.f32 %v999_v45, %v1205_v37 }
 0x1aa   : > { %v672_v47 = vpop.f32.mrf.mxu1 }
 0x1ab   : > { %790 = vst.msk [vmem:[%s1212_s12 + $0x30] sm:$0xff] %vm783_vm2, %v681_v46  ;;  %v673_v48 = vadd.f32 %v1205_v37, %v672_v47 }
 0x1ac   : > { %v1000_v49 = vpop.f32.mrf.mxu1 }
 0x1ad   : > { %788 = vst.msk [vmem:[%s1212_s12 + $0x20] sm:$0xff] %vm783_vm2, %v673_v48  ;;  %v684_v50 = vadd.f32 %v1000_v49, %v1205_v37 }
 0x1ae   : > { %v675_v51 = vpop.f32.mrf.mxu1 }
 0x1af   : > { %791 = vst.msk [vmem:[%s1212_s12 + $0x38] sm:$0xff] %vm783_vm2, %v684_v50  ;;  %v676_v52 = vadd.f32 %v1205_v37, %v675_v51 }
 0x1b0   : > { %v1003_v54 = vpop.f32.mrf.mxu1 }
 0x1b1   : > { %789 = vst.msk [vmem:[%s1212_s12 + $0x28] sm:$0xff] %vm783_vm2, %v676_v52  ;;  %v697_v55 = vadd.f32 %v1003_v54, %v1205_v37 }
 0x1b2   : > { %v688_v56 = vpop.f32.mrf.mxu1 }
 0x1b3   : > { %794 = vst.msk [vmem:[%s1212_s12 + $0x50] sm:$0xff] %vm783_vm2, %v697_v55  ;;  %v689_v57 = vadd.f32 %v1205_v37, %v688_v56 }
 0x1b4   : > { %v1004_v58 = vpop.f32.mrf.mxu1 }
 0x1b5   : > { %792 = vst.msk [vmem:[%s1212_s12 + $0x40] sm:$0xff] %vm783_vm2, %v689_v57  ;;  %v700_v59 = vadd.f32 %v1004_v58, %v1205_v37 }
 0x1b6   : > { %v691_v60 = vpop.f32.mrf.mxu1 }
 0x1b7   : > { %795 = vst.msk [vmem:[%s1212_s12 + $0x58] sm:$0xff] %vm783_vm2, %v700_v59  ;;  %v692_v61 = vadd.f32 %v1205_v37, %v691_v60 }
 0x1b8   : > { %v1007_v62 = vpop.f32.mrf.mxu1 }
 0x1b9   : > { %793 = vst.msk [vmem:[%s1212_s12 + $0x48] sm:$0xff] %vm783_vm2, %v692_v61  ;;  %v713_v63 = vadd.f32 %v1007_v62, %v1205_v37 }
 0x1ba   : > { %v704_v0 = vpop.f32.mrf.mxu1 }
 0x1bb   : > { %798 = vst.msk [vmem:[%s1212_s12 + $0x70] sm:$0xff] %vm783_vm2, %v713_v63  ;;  %v705_v1 = vadd.f32 %v1205_v37, %v704_v0 }
 0x1bc   : > { %v1008_v2 = vpop.f32.mrf.mxu1 }
 0x1bd   : > { %796 = vst.msk [vmem:[%s1212_s12 + $0x60] sm:$0xff] %vm783_vm2, %v705_v1  ;;  %v716_v3 = vadd.f32 %v1008_v2, %v1205_v37 }
 0x1be   : > { %v707_v4 = vpop.f32.mrf.mxu1 }
 0x1bf   : > { %799 = vst.msk [vmem:[%s1212_s12 + $0x78] sm:$0xff] %vm783_vm2, %v716_v3  ;;  %v708_v5 = vadd.f32 %v1205_v37, %v707_v4 }
 0x1c0   : > { %v1011_v6 = vpop.f32.mrf.mxu1 }
 0x1c1   : > { %797 = vst.msk [vmem:[%s1212_s12 + $0x68] sm:$0xff] %vm783_vm2, %v708_v5  ;;  %v729_v7 = vadd.f32 %v1011_v6, %v1205_v37 }
 0x1c2   : > { %v720_v8 = vpop.f32.mrf.mxu1 }
 0x1c3   : > { %802 = vst.msk [vmem:[%s1212_s12 + $0x90] sm:$0xff] %vm783_vm2, %v729_v7  ;;  %v721_v9 = vadd.f32 %v1205_v37, %v720_v8 }
 0x1c4   : > { %v1012_v10 = vpop.f32.mrf.mxu1 }
 0x1c5   : > { %800 = vst.msk [vmem:[%s1212_s12 + $0x80] sm:$0xff] %vm783_vm2, %v721_v9  ;;  %v732_v11 = vadd.f32 %v1012_v10, %v1205_v37 }
 0x1c6   : > { %v723_v12 = vpop.f32.mrf.mxu1 }
 0x1c7   : > { %803 = vst.msk [vmem:[%s1212_s12 + $0x98] sm:$0xff] %vm783_vm2, %v732_v11  ;;  %v724_v13 = vadd.f32 %v1205_v37, %v723_v12 }
 0x1c8   : > { %v1015_v14 = vpop.f32.mrf.mxu1 }
 0x1c9   : > { %801 = vst.msk [vmem:[%s1212_s12 + $0x88] sm:$0xff] %vm783_vm2, %v724_v13  ;;  %v745_v15 = vadd.f32 %v1015_v14, %v1205_v37 }
 0x1ca   : > { %v736_v16 = vpop.f32.mrf.mxu1 }
 0x1cb   : > { %806 = vst.msk [vmem:[%s1212_s12 + $0xb0] sm:$0xff] %vm783_vm2, %v745_v15  ;;  %v737_v17 = vadd.f32 %v1205_v37, %v736_v16 }
 0x1cc   : > { %v1016_v18 = vpop.f32.mrf.mxu1 }
 0x1cd   : > { %804 = vst.msk [vmem:[%s1212_s12 + $0xa0] sm:$0xff] %vm783_vm2, %v737_v17  ;;  %v748_v19 = vadd.f32 %v1016_v18, %v1205_v37 }
 0x1ce   : > { %v739_v20 = vpop.f32.mrf.mxu1 }
 0x1cf   : > { %807 = vst.msk [vmem:[%s1212_s12 + $0xb8] sm:$0xff] %vm783_vm2, %v748_v19  ;;  %v740_v21 = vadd.f32 %v1205_v37, %v739_v20 }
 0x1d0   : > { %v1019_v22 = vpop.f32.mrf.mxu1 }
 0x1d1   : > { %805 = vst.msk [vmem:[%s1212_s12 + $0xa8] sm:$0xff] %vm783_vm2, %v740_v21  ;;  %v761_v23 = vadd.f32 %v1019_v22, %v1205_v37 }
 0x1d2   : > { %v752_v24 = vpop.f32.mrf.mxu1 }
 0x1d3   : > { %810 = vst.msk [vmem:[%s1212_s12 + $0xd0] sm:$0xff] %vm783_vm2, %v761_v23  ;;  %v753_v25 = vadd.f32 %v1205_v37, %v752_v24 }
 0x1d4   : > { %v1020_v26 = vpop.f32.mrf.mxu1 }
 0x1d5   : > { %808 = vst.msk [vmem:[%s1212_s12 + $0xc0] sm:$0xff] %vm783_vm2, %v753_v25  ;;  %v764_v27 = vadd.f32 %v1020_v26, %v1205_v37 }
 0x1d6   : > { %v755_v28 = vpop.f32.mrf.mxu1 }
 0x1d7   : > { %811 = vst.msk [vmem:[%s1212_s12 + $0xd8] sm:$0xff] %vm783_vm2, %v764_v27  ;;  %v756_v29 = vadd.f32 %v1205_v37, %v755_v28 }
 0x1d8   : > { %v1023_v30 = vpop.f32.mrf.mxu1 }
 0x1d9   : > { %809 = vst.msk [vmem:[%s1212_s12 + $0xc8] sm:$0xff] %vm783_vm2, %v756_v29  ;;  %v777_v31 = vadd.f32 %v1023_v30, %v1205_v37 }
 0x1da   : > { %v768_v32 = vpop.f32.mrf.mxu1 }
 0x1db   : > { %814 = vst.msk [vmem:[%s1212_s12 + $0xf0] sm:$0xff] %vm783_vm2, %v777_v31  ;;  %v769_v33 = vadd.f32 %v1205_v37, %v768_v32 }
 0x1dc   : > { %v1024_v34 = vpop.f32.mrf.mxu1 }
 0x1dd   : > { %812 = vst.msk [vmem:[%s1212_s12 + $0xe0] sm:$0xff] %vm783_vm2, %v769_v33  ;;  %v780_v35 = vadd.f32 %v1024_v34, %v1205_v37 }
 0x1de   : > { %v771_v36 = vpop.f32.mrf.mxu1 }
 0x1df   : > { %815 = vst.msk [vmem:[%s1212_s12 + $0xf8] sm:$0xff] %vm783_vm2, %v780_v35  ;;  %v772_v53 = vadd.f32 %v1205_v37, %v771_v36 }
 0x1e1   : > { %813 = vst.msk [vmem:[%s1212_s12 + $0xe8] sm:$0xff] %vm783_vm2, %v772_v53 }
 0x1e2 PF: > { %s15_s18 = sadd.s32 1, %s1042_s18  }
 0x1e3   : > { %p12_p4 = scmp.ge.s32.totalorder %s15_s18, 4  }
 0x1e5   :  { %14 = sbr.rel (!%p12_p4) target bundleno = 1 (0x1), region = 70 }

</bundles_post_ra>
